<compile_context>
chip_gen: v7x
topology: tpu7x:2x2x1
jax: 0.10.0
libtpu: 0.0.40
codegen_flags: <defaults>
</compile_context>

<pallas_src>
import numpy as np
import jax
import jax.numpy as jnp
from jax.experimental import pallas as pl
from jax.experimental.pallas import tpu as pltpu  # noqa: F401 (kept for easy grid/CompilerParams reintroduction)

# ---- module hyper-parameters (from Cross_Attention_Encoder.__init__) ----
N_HEAD = 2
D_K = 16
D_V = 16
D_MODEL = 32
D_INNER = 64
LN_EPS = 1e-5          # torch.nn.LayerNorm default
NEG_INF = -1e30        # stands in for float('-inf') in masked_fill

# ---- packed-parameter layout ----
# weight slab: every weight whose input dim is d_model, concatenated on columns
_OFF_WQ = 0
_OFF_WK = _OFF_WQ + N_HEAD * D_K      # 32
_OFF_WV = _OFF_WK + N_HEAD * D_K      # 64
_OFF_WO = _OFF_WV + N_HEAD * D_V      # 96
_OFF_W1 = _OFF_WO + D_MODEL           # 128
_W_SLAB_COLS = _OFF_W1 + D_INNER      # 192

# bias / LayerNorm slab: one vector per row, padded to 64 lanes
(_R_BQ, _R_BK, _R_BV, _R_BO, _R_LN1G, _R_LN1B,
 _R_FB1, _R_FB2, _R_LN2G, _R_LN2B) = range(10)
_VEC_COLS = 64


def make_kernel(bsz, pad_len):
    inv_temp = float(1.0 / np.sqrt(D_K))
    BL = bsz * pad_len

    def kernel(xq_ref, xkv_ref, keym_ref, npm_ref, w_ref, w2_ref, vec_ref,
               out_ref):
        f32 = jnp.float32
        x_q = xq_ref[...]          # (BL, D)   queries   = visual feats (flattened)
        x_kv = xkv_ref[...]        # (BL, D)   keys/vals = textual feats (flattened)
        npm = npm_ref[...]         # (BL, 1)   1.0 where the row is a real object
        W = w_ref[...]             # (D, 192)  [wq | wk | wv | wo | w1]
        W2 = w2_ref[...]           # (d_inner, D)
        vec = vec_ref[...]         # (10, 64)  biases + LayerNorm params

        bq = vec[_R_BQ:_R_BQ + 1, :N_HEAD * D_K]
        bk = vec[_R_BK:_R_BK + 1, :N_HEAD * D_K]
        bv = vec[_R_BV:_R_BV + 1, :N_HEAD * D_V]
        bo = vec[_R_BO:_R_BO + 1, :D_MODEL]
        g1 = vec[_R_LN1G:_R_LN1G + 1, :D_MODEL]
        be1 = vec[_R_LN1B:_R_LN1B + 1, :D_MODEL]
        b1 = vec[_R_FB1:_R_FB1 + 1, :D_INNER]
        b2 = vec[_R_FB2:_R_FB2 + 1, :D_MODEL]
        g2 = vec[_R_LN2G:_R_LN2G + 1, :D_MODEL]
        be2 = vec[_R_LN2B:_R_LN2B + 1, :D_MODEL]

        # key-validity mask, broadcast once (hoisted out of the head loop)
        keymask = jnp.broadcast_to(keym_ref[...] > 0.5,
                                   (bsz, pad_len, pad_len))      # (B, L, L)

        # --- multi-head attention: per-head weight slices, accumulate into the
        #     output projection (no activation-side concat) ---
        attn = jnp.zeros((BL, D_MODEL), f32)
        for h in range(N_HEAD):
            cq = slice(_OFF_WQ + h * D_K, _OFF_WQ + (h + 1) * D_K)
            ck = slice(_OFF_WK + h * D_K, _OFF_WK + (h + 1) * D_K)
            cv = slice(_OFF_WV + h * D_V, _OFF_WV + (h + 1) * D_V)
            qh = jnp.dot(x_q, W[:, cq], preferred_element_type=f32) \
                + bq[:, h * D_K:(h + 1) * D_K]
            kh = jnp.dot(x_kv, W[:, ck], preferred_element_type=f32) \
                + bk[:, h * D_K:(h + 1) * D_K]
            vh = jnp.dot(x_kv, W[:, cv], preferred_element_type=f32) \
                + bv[:, h * D_V:(h + 1) * D_V]
            qh = qh.reshape(bsz, pad_len, D_K)
            kh = kh.reshape(bsz, pad_len, D_K)
            vh = vh.reshape(bsz, pad_len, D_V)

            # (B, L, L) logits = qh @ kh^T / sqrt(d_k), masked per key position
            logits = jnp.einsum('bqd,bkd->bqk', qh, kh,
                                preferred_element_type=f32) * inv_temp
            logits = jnp.where(keymask, logits, NEG_INF)
            logits = logits - jnp.max(logits, axis=-1, keepdims=True)
            p = jnp.exp(logits)
            p = p * pl.reciprocal(jnp.sum(p, axis=-1, keepdims=True),
                                  approx=True)                    # softmax
            oh = jnp.einsum('bqk,bkd->bqd', p, vh,
                            preferred_element_type=f32)           # (B, L, d_v)

            wo_h = W[h * D_V:(h + 1) * D_V, _OFF_WO:_OFF_WO + D_MODEL]
            attn = attn + jnp.dot(oh.reshape(BL, D_V), wo_h,
                                  preferred_element_type=f32)

        # output-projection bias + residual (= q input) + LayerNorm + pad mask
        o = attn + bo + x_q
        mean = jnp.mean(o, axis=-1, keepdims=True)
        var = jnp.mean((o - mean) ** 2, axis=-1, keepdims=True)
        o = (o - mean) * jax.lax.rsqrt(var + LN_EPS) * g1 + be1
        o = o * npm                                   # enc_output *= non_pad_mask

        # --- position-wise FFN (Conv1d kernel_size=1 == matmul) ---
        h1 = jnp.maximum(
            jnp.dot(o, W[:, _OFF_W1:_OFF_W1 + D_INNER],
                    preferred_element_type=f32) + b1, 0.0)
        h2 = jnp.dot(h1, W2, preferred_element_type=f32) + b2
        o2 = h2 + o
        mean2 = jnp.mean(o2, axis=-1, keepdims=True)
        var2 = jnp.mean((o2 - mean2) ** 2, axis=-1, keepdims=True)
        o2 = (o2 - mean2) * jax.lax.rsqrt(var2 + LN_EPS) * g2 + be2
        o2 = o2 * npm                                 # enc_output *= non_pad_mask
        out_ref[...] = o2.astype(out_ref.dtype)

    return kernel


def init_params(key):
    ks = jax.random.split(key, 12)

    def nrm(k, shape, scale):
        return jax.random.normal(k, shape, dtype=jnp.float32) * scale

    params = [
        nrm(ks[0], (D_MODEL, N_HEAD * D_K), 1.0 / np.sqrt(D_MODEL)),       # wq
        nrm(ks[1], (1, N_HEAD * D_K), 0.02),                               # bq
        nrm(ks[2], (D_MODEL, N_HEAD * D_K), 1.0 / np.sqrt(D_MODEL)),       # wk
        nrm(ks[3], (1, N_HEAD * D_K), 0.02),                               # bk
        nrm(ks[4], (D_MODEL, N_HEAD * D_V), 1.0 / np.sqrt(D_MODEL)),       # wv
        nrm(ks[5], (1, N_HEAD * D_V), 0.02),                               # bv
        nrm(ks[6], (N_HEAD * D_V, D_MODEL), 1.0 / np.sqrt(N_HEAD * D_V)),  # wo (fc)
        nrm(ks[7], (1, D_MODEL), 0.02),                                    # bo
        jnp.ones((1, D_MODEL), jnp.float32),                               # ln1 gamma
        jnp.zeros((1, D_MODEL), jnp.float32),                              # ln1 beta
        nrm(ks[8], (D_MODEL, D_INNER), 1.0 / np.sqrt(D_MODEL)),            # w1
        nrm(ks[9], (1, D_INNER), 0.02),                                    # b1
        nrm(ks[10], (D_INNER, D_MODEL), 1.0 / np.sqrt(D_INNER)),           # w2
        nrm(ks[11], (1, D_MODEL), 0.02),                                   # b2
        jnp.ones((1, D_MODEL), jnp.float32),                               # ln2 gamma
        jnp.zeros((1, D_MODEL), jnp.float32),                              # ln2 beta
    ]
    return params


def pack_params(params):
    (wq, bq, wk, bk, wv, bv, wo, bo, g1, be1, w1, b1, w2, b2, g2, be2) = params
    w_slab = jnp.concatenate([wq, wk, wv, wo, w1], axis=1)       # (32, 192)

    def pad_row(v):
        return jnp.pad(v, ((0, 0), (0, _VEC_COLS - v.shape[1])))

    vec = jnp.concatenate([pad_row(x) for x in
                           (bq, bk, bv, bo, g1, be1, b1, b2, g2, be2)],
                          axis=0)                                 # (10, 64)
    return w_slab, w2, vec


def _pad_split(feats, num_objs, pad_len):
    offs = np.cumsum([0] + list(num_objs))
    rows = []
    for b, n in enumerate(num_objs):
        seq = feats[offs[b]:offs[b] + n]
        rows.append(jnp.pad(seq, ((0, pad_len - n), (0, 0))))
    return jnp.stack(rows, 0)


def cross_attention_encoder(visual_feats, textual_feats, num_objs, params):
    bsz = len(num_objs)
    d_model = visual_feats.shape[-1]
    # round pad_len up to a sublane multiple: keeps in-kernel reshapes aligned
    # and the flat matmul M-dim dense.
    pad_len = ((int(max(num_objs)) + 7) // 8) * 8
    BL = bsz * pad_len

    vis = _pad_split(visual_feats, num_objs, pad_len).reshape(BL, d_model)
    txt = _pad_split(textual_feats, num_objs, pad_len).reshape(BL, d_model)

    valid = (np.arange(pad_len)[None, :] <
             np.asarray(num_objs)[:, None]).astype(np.float32)    # (B, L)
    keym = jnp.asarray(valid).reshape(bsz, 1, pad_len)  # key validity (== ~slf_attn_mask)
    npm = jnp.asarray(valid).reshape(BL, 1)             # non_pad_mask, flattened rows

    w_slab, w2, vec = pack_params(params)
    kernel = make_kernel(bsz, pad_len)

    # Single invocation: the whole padded batch + all parameters fit easily in
    # VMEM, so no grid (and no per-step pipeline overhead) is needed.
    out = pl.pallas_call(
        kernel,
        out_shape=jax.ShapeDtypeStruct((BL, d_model), jnp.float32),
    )(vis, txt, keym, npm, w_slab, w2, vec)

    # enc_output[non_pad_mask]  (num_objs is static -> simple host-side gather)
    return jnp.concatenate(
        [out[b * pad_len: b * pad_len + num_objs[b]] for b in range(bsz)],
        axis=0)


# ---------------- pure-JAX reference (for a correctness check) ----------------
def _layernorm(x, g, b):
    m = jnp.mean(x, axis=-1, keepdims=True)
    v = jnp.mean((x - m) ** 2, axis=-1, keepdims=True)
    return (x - m) * jax.lax.rsqrt(v + LN_EPS) * g + b


def reference(visual_feats, textual_feats, num_objs, params):
    (wq, bq, wk, bk, wv, bv, wo, bo, g1, be1, w1, b1, w2, b2, g2, be2) = params
    bsz = len(num_objs)
    pad_len = int(max(num_objs))
    vis = _pad_split(visual_feats, num_objs, pad_len)
    txt = _pad_split(textual_feats, num_objs, pad_len)
    valid = (np.arange(pad_len)[None, :] <
             np.asarray(num_objs)[:, None]).astype(np.float32)
    keym = jnp.asarray(valid)[:, None, :]                 # (B,1,L)
    npm = jnp.asarray(valid)[:, :, None]                  # (B,L,1)

    B, L, _ = vis.shape
    q = (vis @ wq + bq).reshape(B, L, N_HEAD, D_K).transpose(2, 0, 1, 3)
    k = (txt @ wk + bk).reshape(B, L, N_HEAD, D_K).transpose(2, 0, 1, 3)
    v = (txt @ wv + bv).reshape(B, L, N_HEAD, D_V).transpose(2, 0, 1, 3)
    logits = jnp.einsum('hbqd,hbkd->hbqk', q, k) / np.sqrt(D_K)
    logits = jnp.where(keym[None] > 0.5, logits, NEG_INF)
    p = jax.nn.softmax(logits, axis=-1)
    o = jnp.einsum('hbqk,hbkd->hbqd', p, v)
    o = o.transpose(1, 2, 0, 3).reshape(B, L, N_HEAD * D_V)
    o = _layernorm(o @ wo + bo + vis, g1, be1) * npm
    h = jax.nn.relu(o @ w1 + b1) @ w2 + b2
    o = _layernorm(h + o, g2, be2) * npm
    return jnp.concatenate([o[b, :num_objs[b]] for b in range(bsz)], axis=0)


if __name__ == "__main__":
    key = jax.random.PRNGKey(0)
    k_param, k_vis, k_txt = jax.random.split(key, 3)

    num_objs = [5, 8]                      # static per-image object counts
    n_total = sum(num_objs)                # 13
    visual_feats = jax.random.normal(k_vis, (n_total, D_MODEL), jnp.float32)
    textual_feats = jax.random.normal(k_txt, (n_total, D_MODEL), jnp.float32)

    params = init_params(k_param)

    out = cross_attention_encoder(visual_feats, textual_feats, num_objs, params)
    out = jax.block_until_ready(out)
    assert out.shape == (n_total, D_MODEL)

    ref = jax.block_until_ready(
        reference(visual_feats, textual_feats, num_objs, params))
    # tighter than before; small slack left for the approx-EUP softmax reciprocal
    np.testing.assert_allclose(np.asarray(out), np.asarray(ref),
                               rtol=5e-3, atol=5e-3)

    print("KERNEL_OK")
</pallas_src>

<mosaic_0001>
module attributes {stable_mosaic.version = 11 : i64} {
  func.func @kernel(%arg0: memref<16x32xf32, #tpu.memory_space<vmem>>, %arg1: memref<16x32xf32, #tpu.memory_space<vmem>>, %arg2: memref<2x1x8xf32, #tpu.memory_space<vmem>>, %arg3: memref<16x1xf32, #tpu.memory_space<vmem>>, %arg4: memref<32x192xf32, #tpu.memory_space<vmem>>, %arg5: memref<64x32xf32, #tpu.memory_space<vmem>>, %arg6: memref<10x64xf32, #tpu.memory_space<vmem>>, %arg7: memref<16x32xf32, #tpu.memory_space<vmem>>) attributes {dimension_semantics = [], scalar_prefetch = 0 : i64, scratch_operands = 0 : i64, tpu.core_type = #tpu.core_type<tc>} {
    %c0 = arith.constant 0 : index
    %c0_0 = arith.constant 0 : index
    %0 = vector.load %arg0[%c0, %c0_0] : memref<16x32xf32, #tpu.memory_space<vmem>>, vector<16x32xf32>
    %c0_1 = arith.constant 0 : index
    %c0_2 = arith.constant 0 : index
    %1 = vector.load %arg1[%c0_1, %c0_2] : memref<16x32xf32, #tpu.memory_space<vmem>>, vector<16x32xf32>
    %c0_3 = arith.constant 0 : index
    %c0_4 = arith.constant 0 : index
    %2 = vector.load %arg3[%c0_3, %c0_4] : memref<16x1xf32, #tpu.memory_space<vmem>>, vector<16x1xf32>
    %c0_5 = arith.constant 0 : index
    %c0_6 = arith.constant 0 : index
    %3 = vector.load %arg4[%c0_5, %c0_6] : memref<32x192xf32, #tpu.memory_space<vmem>>, vector<32x192xf32>
    %c0_7 = arith.constant 0 : index
    %c0_8 = arith.constant 0 : index
    %4 = vector.load %arg5[%c0_7, %c0_8] : memref<64x32xf32, #tpu.memory_space<vmem>>, vector<64x32xf32>
    %c0_9 = arith.constant 0 : index
    %c0_10 = arith.constant 0 : index
    %5 = vector.load %arg6[%c0_9, %c0_10] : memref<10x64xf32, #tpu.memory_space<vmem>>, vector<10x64xf32>
    %6 = vector.extract_strided_slice %5 {offsets = [0, 0], sizes = [1, 32], strides = [1, 1]} : vector<10x64xf32> to vector<1x32xf32>
    %7 = vector.extract_strided_slice %5 {offsets = [1, 0], sizes = [1, 32], strides = [1, 1]} : vector<10x64xf32> to vector<1x32xf32>
    %8 = vector.extract_strided_slice %5 {offsets = [2, 0], sizes = [1, 32], strides = [1, 1]} : vector<10x64xf32> to vector<1x32xf32>
    %9 = vector.extract_strided_slice %5 {offsets = [3, 0], sizes = [1, 32], strides = [1, 1]} : vector<10x64xf32> to vector<1x32xf32>
    %10 = vector.extract_strided_slice %5 {offsets = [4, 0], sizes = [1, 32], strides = [1, 1]} : vector<10x64xf32> to vector<1x32xf32>
    %11 = vector.extract_strided_slice %5 {offsets = [5, 0], sizes = [1, 32], strides = [1, 1]} : vector<10x64xf32> to vector<1x32xf32>
    %12 = vector.extract_strided_slice %5 {offsets = [6, 0], sizes = [1, 64], strides = [1, 1]} : vector<10x64xf32> to vector<1x64xf32>
    %13 = vector.extract_strided_slice %5 {offsets = [7, 0], sizes = [1, 32], strides = [1, 1]} : vector<10x64xf32> to vector<1x32xf32>
    %14 = vector.extract_strided_slice %5 {offsets = [8, 0], sizes = [1, 32], strides = [1, 1]} : vector<10x64xf32> to vector<1x32xf32>
    %15 = vector.extract_strided_slice %5 {offsets = [9, 0], sizes = [1, 32], strides = [1, 1]} : vector<10x64xf32> to vector<1x32xf32>
    %c0_11 = arith.constant 0 : index
    %c0_12 = arith.constant 0 : index
    %c0_13 = arith.constant 0 : index
    %16 = vector.load %arg2[%c0_11, %c0_12, %c0_13] : memref<2x1x8xf32, #tpu.memory_space<vmem>>, vector<2x1x8xf32>
    %cst = arith.constant 5.000000e-01 : f32
    %17 = vector.broadcast %cst : f32 to vector<2x1x8xf32>
    %18 = arith.cmpf ogt, %16, %17 : vector<2x1x8xf32>
    %19 = vector.shape_cast %18 : vector<2x1x8xi1> to vector<2x1x8xi1>
    %20 = vector.broadcast %19 : vector<2x1x8xi1> to vector<2x8x8xi1>
    %cst_14 = arith.constant 0.000000e+00 : f32
    %21 = vector.broadcast %cst_14 : f32 to vector<16x32xf32>
    %22 = vector.extract_strided_slice %3 {offsets = [0, 0], sizes = [32, 16], strides = [1, 1]} : vector<32x192xf32> to vector<32x16xf32>
    %cst_15 = arith.constant dense<0.000000e+00> : vector<16x16xf32>
    %23 = tpu.matmul %0, %22, %cst_15 {dimension_numbers = #tpu.dot_dimension_numbers<[1], [0], [0], [1], [0, 0, 1, 1], [], []>} : vector<16x32xf32>, vector<32x16xf32>, vector<16x16xf32> -> vector<16x16xf32>
    %24 = vector.extract_strided_slice %6 {offsets = [0, 0], sizes = [1, 16], strides = [1, 1]} : vector<1x32xf32> to vector<1x16xf32>
    %25 = vector.broadcast %24 : vector<1x16xf32> to vector<16x16xf32>
    %26 = arith.addf %23, %25 : vector<16x16xf32>
    %27 = vector.extract_strided_slice %3 {offsets = [0, 32], sizes = [32, 16], strides = [1, 1]} : vector<32x192xf32> to vector<32x16xf32>
    %cst_16 = arith.constant dense<0.000000e+00> : vector<16x16xf32>
    %28 = tpu.matmul %1, %27, %cst_16 {dimension_numbers = #tpu.dot_dimension_numbers<[1], [0], [0], [1], [0, 0, 1, 1], [], []>} : vector<16x32xf32>, vector<32x16xf32>, vector<16x16xf32> -> vector<16x16xf32>
    %29 = vector.extract_strided_slice %7 {offsets = [0, 0], sizes = [1, 16], strides = [1, 1]} : vector<1x32xf32> to vector<1x16xf32>
    %30 = vector.broadcast %29 : vector<1x16xf32> to vector<16x16xf32>
    %31 = arith.addf %28, %30 : vector<16x16xf32>
    %32 = vector.extract_strided_slice %3 {offsets = [0, 64], sizes = [32, 16], strides = [1, 1]} : vector<32x192xf32> to vector<32x16xf32>
    %cst_17 = arith.constant dense<0.000000e+00> : vector<16x16xf32>
    %33 = tpu.matmul %1, %32, %cst_17 {dimension_numbers = #tpu.dot_dimension_numbers<[1], [0], [0], [1], [0, 0, 1, 1], [], []>} : vector<16x32xf32>, vector<32x16xf32>, vector<16x16xf32> -> vector<16x16xf32>
    %34 = vector.extract_strided_slice %8 {offsets = [0, 0], sizes = [1, 16], strides = [1, 1]} : vector<1x32xf32> to vector<1x16xf32>
    %35 = vector.broadcast %34 : vector<1x16xf32> to vector<16x16xf32>
    %36 = arith.addf %33, %35 : vector<16x16xf32>
    %37 = vector.shape_cast %26 : vector<16x16xf32> to vector<2x8x16xf32>
    %38 = vector.shape_cast %31 : vector<16x16xf32> to vector<2x8x16xf32>
    %39 = vector.shape_cast %36 : vector<16x16xf32> to vector<2x8x16xf32>
    "tpu.trace_start"() <{level = 10 : i32, message = "bqd,bkd->bqk"}> : () -> ()
    %cst_18 = arith.constant dense<0.000000e+00> : vector<2x8x8xf32>
    %40 = tpu.matmul %37, %38, %cst_18 {dimension_numbers = #tpu.dot_dimension_numbers<[2], [2], [1], [1], [0, 0, 0, 1, 1, 1], [0], [0]>} : vector<2x8x16xf32>, vector<2x8x16xf32>, vector<2x8x8xf32> -> vector<2x8x8xf32>
    "tpu.trace_stop"() : () -> ()
    %cst_19 = arith.constant 2.500000e-01 : f32
    %41 = vector.broadcast %cst_19 : f32 to vector<2x8x8xf32>
    %42 = arith.mulf %40, %41 : vector<2x8x8xf32>
    %cst_20 = arith.constant -1.000000e+30 : f32
    %43 = vector.broadcast %cst_20 : f32 to vector<2x8x8xf32>
    %44 = arith.select %20, %42, %43 : vector<2x8x8xi1>, vector<2x8x8xf32>
    %cst_21 = arith.constant dense<0xFF800000> : vector<2x8xf32>
    %45 = vector.multi_reduction <maximumf>, %44, %cst_21 [2] : vector<2x8x8xf32> to vector<2x8xf32>
    %46 = vector.shape_cast %45 : vector<2x8xf32> to vector<2x8x1xf32>
    %47 = vector.broadcast %46 : vector<2x8x1xf32> to vector<2x8x8xf32>
    %48 = arith.subf %44, %47 : vector<2x8x8xf32>
    %49 = math.exp %48 : vector<2x8x8xf32>
    %cst_22 = arith.constant dense<0.000000e+00> : vector<2x8xf32>
    %50 = vector.multi_reduction <add>, %49, %cst_22 [2] : vector<2x8x8xf32> to vector<2x8xf32>
    %51 = vector.shape_cast %50 : vector<2x8xf32> to vector<2x8x1xf32>
    %52 = tpu.reciprocal %51 {approx = true} : vector<2x8x1xf32> -> vector<2x8x1xf32>
    %53 = vector.broadcast %52 : vector<2x8x1xf32> to vector<2x8x8xf32>
    %54 = arith.mulf %49, %53 : vector<2x8x8xf32>
    "tpu.trace_start"() <{level = 10 : i32, message = "bqk,bkd->bqd"}> : () -> ()
    %cst_23 = arith.constant dense<0.000000e+00> : vector<2x8x16xf32>
    %55 = tpu.matmul %54, %39, %cst_23 {dimension_numbers = #tpu.dot_dimension_numbers<[2], [1], [1], [2], [0, 0, 0, 1, 1, 2], [0], [0]>} : vector<2x8x8xf32>, vector<2x8x16xf32>, vector<2x8x16xf32> -> vector<2x8x16xf32>
    "tpu.trace_stop"() : () -> ()
    %56 = vector.extract_strided_slice %3 {offsets = [0, 96], sizes = [16, 32], strides = [1, 1]} : vector<32x192xf32> to vector<16x32xf32>
    %57 = vector.shape_cast %55 : vector<2x8x16xf32> to vector<16x16xf32>
    %cst_24 = arith.constant dense<0.000000e+00> : vector<16x32xf32>
    %58 = tpu.matmul %57, %56, %cst_24 {dimension_numbers = #tpu.dot_dimension_numbers<[1], [0], [0], [1], [0, 0, 1, 1], [], []>} : vector<16x16xf32>, vector<16x32xf32>, vector<16x32xf32> -> vector<16x32xf32>
    %59 = arith.addf %21, %58 : vector<16x32xf32>
    %60 = vector.extract_strided_slice %3 {offsets = [0, 16], sizes = [32, 16], strides = [1, 1]} : vector<32x192xf32> to vector<32x16xf32>
    %cst_25 = arith.constant dense<0.000000e+00> : vector<16x16xf32>
    %61 = tpu.matmul %0, %60, %cst_25 {dimension_numbers = #tpu.dot_dimension_numbers<[1], [0], [0], [1], [0, 0, 1, 1], [], []>} : vector<16x32xf32>, vector<32x16xf32>, vector<16x16xf32> -> vector<16x16xf32>
    %62 = vector.extract_strided_slice %6 {offsets = [0, 16], sizes = [1, 16], strides = [1, 1]} : vector<1x32xf32> to vector<1x16xf32>
    %63 = vector.broadcast %62 : vector<1x16xf32> to vector<16x16xf32>
    %64 = arith.addf %61, %63 : vector<16x16xf32>
    %65 = vector.extract_strided_slice %3 {offsets = [0, 48], sizes = [32, 16], strides = [1, 1]} : vector<32x192xf32> to vector<32x16xf32>
    %cst_26 = arith.constant dense<0.000000e+00> : vector<16x16xf32>
    %66 = tpu.matmul %1, %65, %cst_26 {dimension_numbers = #tpu.dot_dimension_numbers<[1], [0], [0], [1], [0, 0, 1, 1], [], []>} : vector<16x32xf32>, vector<32x16xf32>, vector<16x16xf32> -> vector<16x16xf32>
    %67 = vector.extract_strided_slice %7 {offsets = [0, 16], sizes = [1, 16], strides = [1, 1]} : vector<1x32xf32> to vector<1x16xf32>
    %68 = vector.broadcast %67 : vector<1x16xf32> to vector<16x16xf32>
    %69 = arith.addf %66, %68 : vector<16x16xf32>
    %70 = vector.extract_strided_slice %3 {offsets = [0, 80], sizes = [32, 16], strides = [1, 1]} : vector<32x192xf32> to vector<32x16xf32>
    %cst_27 = arith.constant dense<0.000000e+00> : vector<16x16xf32>
    %71 = tpu.matmul %1, %70, %cst_27 {dimension_numbers = #tpu.dot_dimension_numbers<[1], [0], [0], [1], [0, 0, 1, 1], [], []>} : vector<16x32xf32>, vector<32x16xf32>, vector<16x16xf32> -> vector<16x16xf32>
    %72 = vector.extract_strided_slice %8 {offsets = [0, 16], sizes = [1, 16], strides = [1, 1]} : vector<1x32xf32> to vector<1x16xf32>
    %73 = vector.broadcast %72 : vector<1x16xf32> to vector<16x16xf32>
    %74 = arith.addf %71, %73 : vector<16x16xf32>
    %75 = vector.shape_cast %64 : vector<16x16xf32> to vector<2x8x16xf32>
    %76 = vector.shape_cast %69 : vector<16x16xf32> to vector<2x8x16xf32>
    %77 = vector.shape_cast %74 : vector<16x16xf32> to vector<2x8x16xf32>
    "tpu.trace_start"() <{level = 10 : i32, message = "bqd,bkd->bqk"}> : () -> ()
    %cst_28 = arith.constant dense<0.000000e+00> : vector<2x8x8xf32>
    %78 = tpu.matmul %75, %76, %cst_28 {dimension_numbers = #tpu.dot_dimension_numbers<[2], [2], [1], [1], [0, 0, 0, 1, 1, 1], [0], [0]>} : vector<2x8x16xf32>, vector<2x8x16xf32>, vector<2x8x8xf32> -> vector<2x8x8xf32>
    "tpu.trace_stop"() : () -> ()
    %cst_29 = arith.constant 2.500000e-01 : f32
    %79 = vector.broadcast %cst_29 : f32 to vector<2x8x8xf32>
    %80 = arith.mulf %78, %79 : vector<2x8x8xf32>
    %cst_30 = arith.constant -1.000000e+30 : f32
    %81 = vector.broadcast %cst_30 : f32 to vector<2x8x8xf32>
    %82 = arith.select %20, %80, %81 : vector<2x8x8xi1>, vector<2x8x8xf32>
    %cst_31 = arith.constant dense<0xFF800000> : vector<2x8xf32>
    %83 = vector.multi_reduction <maximumf>, %82, %cst_31 [2] : vector<2x8x8xf32> to vector<2x8xf32>
    %84 = vector.shape_cast %83 : vector<2x8xf32> to vector<2x8x1xf32>
    %85 = vector.broadcast %84 : vector<2x8x1xf32> to vector<2x8x8xf32>
    %86 = arith.subf %82, %85 : vector<2x8x8xf32>
    %87 = math.exp %86 : vector<2x8x8xf32>
    %cst_32 = arith.constant dense<0.000000e+00> : vector<2x8xf32>
    %88 = vector.multi_reduction <add>, %87, %cst_32 [2] : vector<2x8x8xf32> to vector<2x8xf32>
    %89 = vector.shape_cast %88 : vector<2x8xf32> to vector<2x8x1xf32>
    %90 = tpu.reciprocal %89 {approx = true} : vector<2x8x1xf32> -> vector<2x8x1xf32>
    %91 = vector.broadcast %90 : vector<2x8x1xf32> to vector<2x8x8xf32>
    %92 = arith.mulf %87, %91 : vector<2x8x8xf32>
    "tpu.trace_start"() <{level = 10 : i32, message = "bqk,bkd->bqd"}> : () -> ()
    %cst_33 = arith.constant dense<0.000000e+00> : vector<2x8x16xf32>
    %93 = tpu.matmul %92, %77, %cst_33 {dimension_numbers = #tpu.dot_dimension_numbers<[2], [1], [1], [2], [0, 0, 0, 1, 1, 2], [0], [0]>} : vector<2x8x8xf32>, vector<2x8x16xf32>, vector<2x8x16xf32> -> vector<2x8x16xf32>
    "tpu.trace_stop"() : () -> ()
    %94 = vector.extract_strided_slice %3 {offsets = [16, 96], sizes = [16, 32], strides = [1, 1]} : vector<32x192xf32> to vector<16x32xf32>
    %95 = vector.shape_cast %93 : vector<2x8x16xf32> to vector<16x16xf32>
    %cst_34 = arith.constant dense<0.000000e+00> : vector<16x32xf32>
    %96 = tpu.matmul %95, %94, %cst_34 {dimension_numbers = #tpu.dot_dimension_numbers<[1], [0], [0], [1], [0, 0, 1, 1], [], []>} : vector<16x16xf32>, vector<16x32xf32>, vector<16x32xf32> -> vector<16x32xf32>
    %97 = arith.addf %59, %96 : vector<16x32xf32>
    %98 = vector.broadcast %9 : vector<1x32xf32> to vector<16x32xf32>
    %99 = arith.addf %97, %98 : vector<16x32xf32>
    %100 = arith.addf %99, %0 : vector<16x32xf32>
    %cst_35 = arith.constant dense<0.000000e+00> : vector<16xf32>
    %101 = vector.multi_reduction <add>, %100, %cst_35 [1] : vector<16x32xf32> to vector<16xf32>
    %102 = vector.shape_cast %101 : vector<16xf32> to vector<16x1xf32>
    %cst_36 = arith.constant 3.200000e+01 : f32
    %103 = vector.broadcast %cst_36 : f32 to vector<16x1xf32>
    %104 = arith.divf %102, %103 : vector<16x1xf32>
    %105 = vector.broadcast %104 : vector<16x1xf32> to vector<16x32xf32>
    %106 = arith.subf %100, %105 : vector<16x32xf32>
    %107 = arith.mulf %106, %106 : vector<16x32xf32>
    %cst_37 = arith.constant dense<0.000000e+00> : vector<16xf32>
    %108 = vector.multi_reduction <add>, %107, %cst_37 [1] : vector<16x32xf32> to vector<16xf32>
    %109 = vector.shape_cast %108 : vector<16xf32> to vector<16x1xf32>
    %cst_38 = arith.constant 3.200000e+01 : f32
    %110 = vector.broadcast %cst_38 : f32 to vector<16x1xf32>
    %111 = arith.divf %109, %110 : vector<16x1xf32>
    %112 = vector.broadcast %104 : vector<16x1xf32> to vector<16x32xf32>
    %113 = arith.subf %100, %112 : vector<16x32xf32>
    %cst_39 = arith.constant 9.99999974E-6 : f32
    %114 = vector.broadcast %cst_39 : f32 to vector<16x1xf32>
    %115 = arith.addf %111, %114 : vector<16x1xf32>
    %116 = math.rsqrt %115 : vector<16x1xf32>
    %117 = vector.broadcast %116 : vector<16x1xf32> to vector<16x32xf32>
    %118 = arith.mulf %113, %117 : vector<16x32xf32>
    %119 = vector.broadcast %10 : vector<1x32xf32> to vector<16x32xf32>
    %120 = arith.mulf %118, %119 : vector<16x32xf32>
    %121 = vector.broadcast %11 : vector<1x32xf32> to vector<16x32xf32>
    %122 = arith.addf %120, %121 : vector<16x32xf32>
    %123 = vector.broadcast %2 : vector<16x1xf32> to vector<16x32xf32>
    %124 = arith.mulf %122, %123 : vector<16x32xf32>
    %125 = vector.extract_strided_slice %3 {offsets = [0, 128], sizes = [32, 64], strides = [1, 1]} : vector<32x192xf32> to vector<32x64xf32>
    %cst_40 = arith.constant dense<0.000000e+00> : vector<16x64xf32>
    %126 = tpu.matmul %124, %125, %cst_40 {dimension_numbers = #tpu.dot_dimension_numbers<[1], [0], [0], [1], [0, 0, 1, 1], [], []>} : vector<16x32xf32>, vector<32x64xf32>, vector<16x64xf32> -> vector<16x64xf32>
    %127 = vector.broadcast %12 : vector<1x64xf32> to vector<16x64xf32>
    %128 = arith.addf %126, %127 : vector<16x64xf32>
    %cst_41 = arith.constant 0.000000e+00 : f32
    %129 = vector.broadcast %cst_41 : f32 to vector<16x64xf32>
    %130 = arith.maximumf %128, %129 : vector<16x64xf32>
    %cst_42 = arith.constant dense<0.000000e+00> : vector<16x32xf32>
    %131 = tpu.matmul %130, %4, %cst_42 {dimension_numbers = #tpu.dot_dimension_numbers<[1], [0], [0], [1], [0, 0, 1, 1], [], []>} : vector<16x64xf32>, vector<64x32xf32>, vector<16x32xf32> -> vector<16x32xf32>
    %132 = vector.broadcast %13 : vector<1x32xf32> to vector<16x32xf32>
    %133 = arith.addf %131, %132 : vector<16x32xf32>
    %134 = arith.addf %133, %124 : vector<16x32xf32>
    %cst_43 = arith.constant dense<0.000000e+00> : vector<16xf32>
    %135 = vector.multi_reduction <add>, %134, %cst_43 [1] : vector<16x32xf32> to vector<16xf32>
    %136 = vector.shape_cast %135 : vector<16xf32> to vector<16x1xf32>
    %cst_44 = arith.constant 3.200000e+01 : f32
    %137 = vector.broadcast %cst_44 : f32 to vector<16x1xf32>
    %138 = arith.divf %136, %137 : vector<16x1xf32>
    %139 = vector.broadcast %138 : vector<16x1xf32> to vector<16x32xf32>
    %140 = arith.subf %134, %139 : vector<16x32xf32>
    %141 = arith.mulf %140, %140 : vector<16x32xf32>
    %cst_45 = arith.constant dense<0.000000e+00> : vector<16xf32>
    %142 = vector.multi_reduction <add>, %141, %cst_45 [1] : vector<16x32xf32> to vector<16xf32>
    %143 = vector.shape_cast %142 : vector<16xf32> to vector<16x1xf32>
    %cst_46 = arith.constant 3.200000e+01 : f32
    %144 = vector.broadcast %cst_46 : f32 to vector<16x1xf32>
    %145 = arith.divf %143, %144 : vector<16x1xf32>
    %146 = vector.broadcast %138 : vector<16x1xf32> to vector<16x32xf32>
    %147 = arith.subf %134, %146 : vector<16x32xf32>
    %cst_47 = arith.constant 9.99999974E-6 : f32
    %148 = vector.broadcast %cst_47 : f32 to vector<16x1xf32>
    %149 = arith.addf %145, %148 : vector<16x1xf32>
    %150 = math.rsqrt %149 : vector<16x1xf32>
    %151 = vector.broadcast %150 : vector<16x1xf32> to vector<16x32xf32>
    %152 = arith.mulf %147, %151 : vector<16x32xf32>
    %153 = vector.broadcast %14 : vector<1x32xf32> to vector<16x32xf32>
    %154 = arith.mulf %152, %153 : vector<16x32xf32>
    %155 = vector.broadcast %15 : vector<1x32xf32> to vector<16x32xf32>
    %156 = arith.addf %154, %155 : vector<16x32xf32>
    %157 = vector.broadcast %2 : vector<16x1xf32> to vector<16x32xf32>
    %158 = arith.mulf %156, %157 : vector<16x32xf32>
    %c0_48 = arith.constant 0 : index
    %c0_49 = arith.constant 0 : index
    %159 = vector.load %arg7[%c0_48, %c0_49] : memref<16x32xf32, #tpu.memory_space<vmem>>, vector<16x32xf32>
    tpu.vector_store %arg7[%c0_48, %c0_49], %158 {strides = array<i32>} : memref<16x32xf32, #tpu.memory_space<vmem>>, vector<16x32xf32>,
    return
  }
}

</mosaic_0001>

<bundles_post_ra>
// kernel: tpu_custom_call.1
= control target key start
LH: loop header
LB: loop body
LE: loop exit
PB: predicated region body
PF: predicated region fallthrough
CT: control target
= control target key end

     0   :  { %12 = vsyncpa [#allocation3], 0  ;;  %s2576_s0 = inlined_call_operand.vmem [shape: f32[16,32], index: 0, kind: input, shape index: {}]   ;;  %s2577_s1 = inlined_call_operand.vmem [shape: f32[16,32], index: 1, kind: input, shape index: {}]   ;;  %s2578_s2 = inlined_call_operand.vmem [shape: f32[2,1,8], index: 2, kind: input, shape index: {}]   ;;  %s2579_s3 = inlined_call_operand.vmem [shape: f32[16,1], index: 3, kind: input, shape index: {}]   ;;  %s2580_s4 = inlined_call_operand.vmem [shape: f32[32,192], index: 4, kind: input, shape index: {}]   ;;  %s2581_s5 = inlined_call_operand.vmem [shape: f32[64,32], index: 5, kind: input, shape index: {}]   ;;  %s2582_s6 = inlined_call_operand.hbm [shape: f32[10,64], index: 6, kind: input, shape index: {}]   ;;  %s2583_s7 = inlined_call_operand.hbm [shape: f32[16,32], index: 7, kind: output, shape index: {}]  }
   0x1   :  { %13 = vsyncpa [#allocation4], 0  ;;  %s2236_s24 = smov [#allocation2]   ;;  %s2188_s28 = scalar_lea.hbm %s2582_s6, 256 }
   0x2   :  { %s31_s25 = sshll.u32 %s2236_s24, 4  ;;  %p2189_p0 = scmp.ne.s32.totalorder %s2582_s6, %s2188_s28  ;;  %s32_s25 = int_to_ptr.vmem [resolvable:$true] %s31_s25 }
   0x3   :  { %p2192_p1 = scmp.lt.u32.totalorder %s2188_s28, %s2582_s6 }
   0x5   :  { %p2194_p2 = pnand %p2192_p1, %p2189_p0 }
   0x7   :  { %2197 = shalt.err (!%p2194_p2)
}
   0x8   :  { %s2198_s10 = scalar_lea.vmem %s32_s25, 256  ;;  %p2203_p4 = scmp.lt.s32.totalorder %s32_s25, %s32_s25 }
   0x9   :  { %p2199_p3 = scmp.ne.s32.totalorder %s32_s25, %s2198_s10  ;;  %p2204_p5 = scmp.lt.s32.totalorder %s2198_s10, %s2198_s10 }
   0xb   :  { %p2205_p6 = por %p2204_p5, %p2203_p4 }
   0xd   :  { %p2206_p7 = pnand %p2205_p6, %p2199_p3 }
   0xf   :  { %2209 = shalt.err (!%p2206_p7)
}
  0x10   :  { %s2237_s11 = smov 128   ;;  %s2238_s12 = smov 8  }
  0x11   :  { %37 = dma.hbm_to_vmem [thread:$0]  %s2582_s6, 256, %s32_s25, [#allocation3], %s2237_s11, %s2237_s11, %s2238_s12  }
  0x12   :  { %2232 = dma.done.wait [#allocation3], 256  }
  0x13   :  { %2233 = vsyncadd [#allocation3], 4294967040  ;;  %vm85_vm0 = vcmask 261120   ;;  %v47_v0 = vld [vmem:[%s2580_s4] sm:$0xff]  ;;  %v49_v1 = vld [vmem:[%s2580_s4 + $0x10] sm:$0xff]  ;;  %s2239_s24 = smov 96   ;;  %v71_v23 = vlaneseq }
  0x14   :  { %v51_v2 = vld [vmem:[%s2580_s4 + $0x20] sm:$0xff]  ;;  %v2313_v3 = vpack.i.bf16 %v49_v1, %v47_v0  ;;  %v53_v4 = vld [vmem:[%s2580_s4 + $0x30] sm:$0xff]  ;;  %v2007_v5 = vpack.c.bf16 %v49_v1, %v47_v0  ;;  %v2339_v10 = vld [vmem:[%s2576_s0 + $0x8] sm:$0xff]  ;;  %v2240_v20 = vmov 0.0   ;;  %vm2241_vm1 = vmmov 0   ;;  %s2242_s30 = smov 64  }
  0x15   :  { %v2321_v6 = vld [vmem:[%s2576_s0] sm:$0xff]  ;;  %v2011_v7 = vpack.c.bf16 %v53_v4, %v51_v2  ;;  %v2326_v8 = vpack.i.bf16 %v53_v4, %v51_v2  ;;  %v2348_v19 = vld [vmem:[%s2577_s1 + $0x8] sm:$0xff]  ;;  %v2357_v24 = vshrl.u32 %v71_v23, 7  ;;  %vm359_vm2 = vcmask 130048   ;;  %s2245_s13 = smov 112   ;;  %s2246_s14 = smov 48  }
  0x16   :  { %1865 = vmatprep.mubr.msk.f32.mxu1 %vm85_vm0, %v2321_v6  ;;  %2103 = vrot.lane.b32.xlu0 %v2313_v3, %s2239_s24  ;;  %v2331_v9 = vld [vmem:[%s2577_s1] sm:$0xff]  ;;  %v2243_v36 = vmov 0   ;;  %vm516_vm6 = vcmask 64512   ;;  %s2247_s15 = smov 32   ;;  %vm1606_vm8 = vcmask 523264  }
  0x17   :  { %2008 = vmatprep.subr.bf16.mxu1 %v2007_v5  ;;  %1887 = vmatprep.mubr.msk.f32.mxu0 %vm85_vm0, %v2331_v9  ;;  %v169_v25 = vsub.s32 1, %v2357_v24  ;;  %v2360_v26 = vld [vmem:[#allocation2] sm:$0xff]  ;;  %v2363_v27 = vsub.s32 0, %v2357_v24 }
  0x18   :  { %2010 = vmatpush3.bf16.msra.mxu1 %v2007_v5  ;;  %2113 = vrot.lane.b32.xlu1 %v2313_v3, %s2242_s30  ;;  %v65_v45 = vld [vmem:[%s2578_s2] sm:$0x1]  ;;  %v66_v46 = vld [vmem:[%s2578_s2 + $0x1] sm:$0x1]  ;;  %s2244_s2 = smov 80  }
  0x19   :  { %2012 = vmatprep.subr.bf16.mxu1 %v2011_v7  ;;  %v2368_v28 = vrot.slane %v2360_v26, %v169_v25  ;;  %v84_v30 = vrot.slane %v2360_v26, %v2363_v27  ;;  %2163 = vset.pattern.permute.xlu1 %v2243_v36  ;;  %vm67_vm3 = vcmp.gt.f32.partialorder %v65_v45, 0.5  ;;  %vm68_vm4 = vcmp.gt.f32.partialorder %v66_v46, 0.5 }
  0x1a   :  { %2108 = vrot.lane.b32.xlu0 %v2326_v8, %s2239_s24  ;;  %v69_v47 = vsel %vm67_vm3, 1, %v2243_v36  ;;  %v70_v49 = vsel %vm68_vm4, 1, %v2243_v36 }
  0x1b   :  { %2162 = vset.pattern.permute.xlu0 %v2243_v36  ;;  %v74_v48 = vrot.slane %v69_v47, %v2363_v27  ;;  %v78_v52 = vrot.slane %v70_v49, %v2363_v27 }
  0x1c   :  { %2014 = vmatpush3.bf16.msra.mxu1 %v2011_v7  ;;  %2118 = vrot.lane.b32.xlu1 %v2326_v8, %s2242_s30 }
  0x1d   :  { %vm2396_vm5 = vcmp.eq.s32.totalorder %v74_v48, 1  ;;  %vm2404_vm7 = vcmp.eq.s32.totalorder %v78_v52, 1 }
  0x1f   :  { %1866 = vmatmul.mubr.msk.f32.vlgmr.msra.gmra.mrb[0].mxu1 %vm85_vm0, %v2339_v10 }
  0x20   :  { %1876 = vmatprep.mubr.msk.f32.mxu1 %vm85_vm0, %v2331_v9 }
  0x88   :  { %v2104_v11 = vpop.permute.xlu0 %2103 }
  0x89   :  { %v2106_v12 = vunpack.i.h.bf16 %v2104_v11  ;;  %v2105_v13 = vunpack.i.l.bf16 %v2104_v11 }
  0x8a   :  { %v2114_v37 = vpop.permute.xlu1 %2113 }
  0x8b   :  { %v2015_v14 = vpack.c.bf16 %v2106_v12, %v2105_v13  ;;  %v2116_v38 = vunpack.i.h.bf16 %v2114_v37  ;;  %v2115_v39 = vunpack.i.l.bf16 %v2114_v37 }
  0x8c   :  { %v2109_v15 = vpop.permute.xlu0 %2108 }
  0x8d   :  { %v2111_v16 = vunpack.i.h.bf16 %v2109_v15  ;;  %v2110_v17 = vunpack.i.l.bf16 %v2109_v15  ;;  %2016 = vmatprep.subr.bf16.mxu1 %v2015_v14  ;;  %v2023_v40 = vpack.c.bf16 %v2116_v38, %v2115_v39 }
  0x8e   :  { %2018 = vmatpush3.bf16.msra.mxu1 %v2015_v14  ;;  %v2119_v41 = vpop.permute.xlu1 %2118  ;;  %v270_v14 = vsub.s32 2, %v2357_v24 }
  0x8f   :  { %v2019_v18 = vpack.c.bf16 %v2111_v16, %v2110_v17  ;;  %v2121_v42 = vunpack.i.h.bf16 %v2119_v41  ;;  %v2120_v43 = vunpack.i.l.bf16 %v2119_v41  ;;  %2024 = vmatprep.subr.bf16.mxu0 %v2023_v40 }
  0x90   :  { %2026 = vmatpush3.bf16.msra.mxu0 %v2023_v40  ;;  %v2420_v15 = vrot.slane %v2360_v26, %v270_v14 }
  0x91   :  { %2020 = vmatprep.subr.bf16.mxu1 %v2019_v18  ;;  %v2027_v44 = vpack.c.bf16 %v2121_v42, %v2120_v43 }
  0x92   :  { %2022 = vmatpush3.bf16.msra.mxu1 %v2019_v18 }
  0x93   :  { %1890 = vmatprep.subr.mxu1 %v2240_v20  ;;  %2028 = vmatprep.subr.bf16.mxu0 %v2027_v44 }
  0x94   :  { %2030 = vmatpush3.bf16.msra.mxu0 %v2027_v44 }
  0x95   :  { %1877 = vmatmul.mubr.msk.f32.vlgmr.msra.gmra.mrb[2].mxu1 %vm85_vm0, %v2348_v19  ;;  %1900 = vmatprep.subr.mxu0 %v2240_v20 }
  0x96   :  { %1892 = vmatprep.mubr.msk.f32.mxu1 %vm2241_vm1, %v2240_v20 }
  0x97   :  { %1888 = vmatmul.mubr.msk.f32.vlgmr.msra.gmra.mrb[0].mxu0 %vm85_vm0, %v2348_v19 }
  0x98   :  { %1902 = vmatprep.mubr.msk.f32.mxu0 %vm2241_vm1, %v2240_v20 }
  0xf2   :  { %v1867_v21 = vpop.f32.mrb[0].mxu1 }
  0xf3   :  { %v158_v22 = vpop.f32.mrb[1].mxu1  ;;  %v164_v35 = vadd.f32 %v1867_v21, %v84_v30 }
  0xf4   :  { %v159_v33 = vadd.f32 %v158_v22, %v84_v30 }
 0x168   :  { %v1878_v29 = vpop.f32.mrb[2].mxu1 }
 0x169   :  { %v259_v31 = vpop.f32.mrb[3].mxu1  ;;  %v265_v34 = vadd.f32 %v1878_v29, %v2368_v28 }
 0x16a   :  { %v260_v32 = vadd.f32 %v259_v31, %v2368_v28  ;;  %v1889_v16 = vpop.f32.mrb[0].mxu0 }
 0x16b   :  { %v350_v17 = vpop.f32.mrb[1].mxu0  ;;  %v356_v29 = vadd.f32 %v1889_v16, %v2420_v15 }
 0x16c   :  { %1891 = vmatpush3.xpose.msk.msra.mxu1 %vm359_vm2, %v260_v32  ;;  %v351_v21 = vadd.f32 %v350_v17, %v2420_v15 }
 0x16d   :  { %1895 = vmatprep.subr.mxu1 %v2240_v20 }
 0x16e   :  { %1901 = vmatpush3.msra.mxu0 %v351_v21 }
 0x16f   :  { %1893 = vmatmul.mubr.msk.f32.vlgmr.msra.gmra.mrb[4].mxu1 %vm359_vm2, %v159_v33 }
 0x170   :  { %1896 = vmatpush3.xpose.msk.msra.mxu1 %vm359_vm2, %v265_v34  ;;  %1897 = vmatprep.mubr.msk.f32.mxu1 %vm2241_vm1, %v2240_v20 }
 0x171   :  { %1905 = vmatprep.subr.mxu1 %v2240_v20 }
 0x173   :  { %1898 = vmatmul.mubr.msk.f32.vlgmr.msra.gmra.mrb[6].mxu1 %vm359_vm2, %v164_v35 }
 0x174   :  { %1907 = vmatprep.mubr.msk.f32.mxu1 %vm2241_vm1, %v2240_v20  ;;  %1906 = vmatpush3.msra.mxu1 %v356_v29 }
 0x242   :  { %v432_v50 = vpop.f32.mrb[4].mxu1 }
 0x243   :  { %v512_v53 = vmul.f32 0.25, %v432_v50  ;;  %v1894_v54 = vpop.f32.mrb[5].mxu1 }
 0x245   :  { %v514_v55 = vsel %vm2396_vm5, %v512_v53, -1e+30 }
 0x246   :  { %v508_v56 = vpop.f32.mrb[6].mxu1  ;;  %v517_v57 = vsel %vm516_vm6, %v514_v55, -inf }
 0x247   :  { %v513_v59 = vmul.f32 0.25, %v508_v56  ;;  %518 = vmax.xlane.f32.xlu1 %v517_v57  ;;  %v1899_v60 = vpop.f32.mrb[7].mxu1 }
 0x249   :  { %v515_v61 = vsel %vm2404_vm7, %v513_v59, -1e+30 }
 0x24a   :  { %v520_v62 = vsel %vm516_vm6, %v515_v61, -inf }
 0x24b   :  { %521 = vmax.xlane.f32.xlu0 %v520_v62 }
 0x258   :  { %2123 = vrot.lane.b32.xlu1 %v2313_v3, %s2244_s2 }
 0x25c   :  { %2133 = vrot.lane.b32.xlu1 %v2326_v8, %s2244_s2 }
 0x260   :  { %2138 = vrot.lane.b32.xlu1 %v2326_v8, %s2245_s13 }
 0x264   :  { %698 = vrot.lane.b32.xlu1 %v84_v30, %s2245_s13 }
 0x268   :  { %2148 = vrot.lane.b32.xlu1 %v2326_v8, %s2246_s14 }
 0x2d4   :  { %v519_v63 = vpop.xlane.xlu1 %518 }
 0x2d5   :  { %v523_v0 = vsub.f32 %v514_v55, %v519_v63 }
 0x2d7   :  { %v525_v1 = vmul.f32 1.442695, %v523_v0 }
 0x2d8   :  { %v522_v2 = vpop.xlane.xlu0 %521  ;;  %v2124_v18 = vpop.permute.xlu1 %2123 }
 0x2d9   :  { %2164 = vpow2.f32 %v525_v1  ;;  %v524_v4 = vsub.f32 %v515_v61, %v522_v2  ;;  %v2126_v22 = vunpack.i.h.bf16 %v2124_v18  ;;  %v2125_v23 = vunpack.i.l.bf16 %v2124_v18 }
 0x2db   :  { %v527_v5 = vmul.f32 1.442695, %v524_v4  ;;  %v2039_v30 = vpack.c.bf16 %v2126_v22, %v2125_v23 }
 0x2dc   :  { %v2134_v31 = vpop.permute.xlu1 %2133 }
 0x2dd   :  { %2166 = vpow2.f32 %v527_v5  ;;  %2040 = vmatprep.subr.bf16.mxu1 %v2039_v30  ;;  %v2136_v43 = vunpack.i.h.bf16 %v2134_v31  ;;  %v2135_v44 = vunpack.i.l.bf16 %v2134_v31 }
 0x2df   :  { %v2043_v47 = vpack.c.bf16 %v2136_v43, %v2135_v44 }
 0x2e0   :  { %v2139_v34 = vpop.permute.xlu1 %2138 }
 0x2e1   :  { %v2141_v36 = vunpack.i.h.bf16 %v2139_v34  ;;  %v2140_v37 = vunpack.i.l.bf16 %v2139_v34 }
 0x2e3   :  { %v2165_v7 = vpop.eup %2164  ;;  %v2035_v45 = vpack.c.bf16 %v2141_v36, %v2140_v37 }
 0x2e4   :  { %v529_v11 = vsel %vm516_vm6, %v2165_v7, 0.0  ;;  %v699_v56 = vpop.permute.xlu1 %698 }
 0x2e5   :  { %530 = vadd.xlane.f32.xlu0 %v529_v11 }
 0x2e7   :  { %v2167_v12 = vpop.eup %2166 }
 0x2e8   :  { %v532_v13 = vsel %vm516_vm6, %v2167_v12, 0.0  ;;  %v2149_v0 = vpop.permute.xlu1 %2148 }
 0x2e9   :  { %533 = vadd.xlane.f32.xlu0 %v532_v13  ;;  %v2151_v4 = vunpack.i.h.bf16 %v2149_v0  ;;  %v2150_v5 = vunpack.i.l.bf16 %v2149_v0 }
 0x2eb   :  { %v2051_v11 = vpack.c.bf16 %v2151_v4, %v2150_v5 }
 0x2ff   :  { %2128 = vrot.lane.b32.xlu0 %v2313_v3, %s2245_s13 }
 0x303   :  { %789 = vrot.lane.b32.xlu0 %v2368_v28, %s2245_s13 }
 0x307   :  { %2143 = vrot.lane.b32.xlu0 %v2313_v3, %s2246_s14 }
 0x372   :  { %v531_v32 = vpop.xlane.xlu0 %530 }
 0x373   :  { %2168 = vrcp.f32 %v531_v32 }
 0x376   :  { %v534_v33 = vpop.xlane.xlu0 %533 }
 0x377   :  { %2170 = vrcp.f32 %v534_v33 }
 0x37a   :  { %v2129_v35 = vpop.permute.xlu0 %2128 }
 0x37b   :  { %v2131_v38 = vunpack.i.h.bf16 %v2129_v35  ;;  %v2130_v39 = vunpack.i.l.bf16 %v2129_v35 }
 0x37d   :  { %v2169_v40 = vpop.eup %2168  ;;  %v2031_v41 = vpack.c.bf16 %v2131_v38, %v2130_v39 }
 0x37e   :  { %v537_v42 = vmul.f32 %v2169_v40, %v2165_v7 }
 0x37f   :  { %2032 = vmatprep.subr.bf16.mxu0 %v2031_v41 }
 0x380   :  { %1903 = vmatmul.mubr.msk.f32.vlgmr.msra.gmra.mrb[2].mxu0 %vm516_vm6, %v537_v42 }
 0x381   :  { %v2171_v28 = vpop.eup %2170  ;;  %2034 = vmatpush3.bf16.msra.mxu0 %v2031_v41  ;;  %1918 = vmatprep.mubr.msk.f32.mxu0 %vm85_vm0, %v2321_v6 }
 0x382   :  { %v538_v46 = vmul.f32 %v2171_v28, %v2167_v12  ;;  %2036 = vmatprep.subr.bf16.mxu0 %v2035_v45 }
 0x384   :  { %1908 = vmatmul.mubr.msk.f32.vlgmr.msra.gmra.mrb[8].mxu1 %vm516_vm6, %v538_v46 }
 0x385   :  { %2042 = vmatpush3.bf16.msra.mxu1 %v2039_v30  ;;  %1929 = vmatprep.mubr.msk.f32.mxu1 %vm85_vm0, %v2331_v9 }
 0x386   :  { %2044 = vmatprep.subr.bf16.mxu1 %v2043_v47  ;;  %2038 = vmatpush3.bf16.msra.mxu0 %v2035_v45 }
 0x389   :  { %2046 = vmatpush3.bf16.msra.mxu1 %v2043_v47  ;;  %1919 = vmatmul.mubr.msk.f32.vlgmr.msra.gmra.mrb[4].mxu0 %vm85_vm0, %v2339_v10 }
 0x38a   :  { %1943 = vmatprep.subr.mxu1 %v2240_v20  ;;  %1940 = vmatprep.mubr.msk.f32.mxu0 %vm85_vm0, %v2331_v9  ;;  %v790_v9 = vpop.permute.xlu0 %789 }
 0x38c   :  { %1930 = vmatmul.mubr.msk.f32.vlgmr.msra.gmra.mrb[10].mxu1 %vm85_vm0, %v2348_v19 }
 0x38d   :  { %1945 = vmatprep.mubr.msk.f32.mxu1 %vm2241_vm1, %v2240_v20 }
 0x38e   :  { %v2144_v63 = vpop.permute.xlu0 %2143 }
 0x38f   :  { %v2146_v1 = vunpack.i.h.bf16 %v2144_v63  ;;  %v2145_v2 = vunpack.i.l.bf16 %v2144_v63 }
 0x391   :  { %v2047_v7 = vpack.c.bf16 %v2146_v1, %v2145_v2 }
 0x393   :  { %2048 = vmatprep.subr.bf16.mxu0 %v2047_v7 }
 0x394   :  { %2050 = vmatpush3.bf16.msra.mxu0 %v2047_v7 }
 0x395   :  { %2052 = vmatprep.subr.bf16.mxu0 %v2051_v11 }
 0x398   :  { %2054 = vmatpush3.bf16.msra.mxu0 %v2051_v11 }
 0x399   :  { %1953 = vmatprep.subr.mxu0 %v2240_v20 }
 0x39b   :  { %1941 = vmatmul.mubr.msk.f32.vlgmr.msra.gmra.mrb[6].mxu0 %vm85_vm0, %v2348_v19 }
 0x39c   :  { %1955 = vmatprep.mubr.msk.f32.mxu0 %vm2241_vm1, %v2240_v20 }
 0x453   :  { %v2445_v48 = vpop.f32.mrb[2].mxu0 }
 0x454   :  { %v1904_v49 = vpop.f32.mrb[3].mxu0 }
 0x457   :  { %v2447_v50 = vpop.f32.mrb[8].mxu1 }
 0x458   :  { %v1909_v52 = vpop.f32.mrb[9].mxu1 }
 0x45c   :  { %v1920_v53 = vpop.f32.mrb[4].mxu0 }
 0x45d   :  { %v767_v54 = vpop.f32.mrb[5].mxu0  ;;  %v773_v62 = vadd.f32 %v1920_v53, %v699_v56 }
 0x45e   :  { %v768_v60 = vadd.f32 %v767_v54, %v699_v56 }
 0x45f   :  { %v1931_v55 = vpop.f32.mrb[10].mxu1 }
 0x460   :  { %v858_v57 = vpop.f32.mrb[11].mxu1  ;;  %v864_v61 = vadd.f32 %v1931_v55, %v790_v9 }
 0x461   :  { %v859_v59 = vadd.f32 %v858_v57, %v790_v9  ;;  %v1458_v57 = vsub.s32 3, %v2357_v24 }
 0x463   :  { %1944 = vmatpush3.xpose.msk.msra.mxu1 %vm359_vm2, %v859_v59  ;;  %v1459_v59 = vrot.slane %v2360_v26, %v1458_v57  ;;  %v62_v57 = vld [vmem:[%s2581_s5 + $0x38] sm:$0xff] }
 0x464   :  { %1948 = vmatprep.subr.mxu1 %v2240_v20 }
 0x466   :  { %1946 = vmatmul.mubr.msk.f32.vlgmr.msra.gmra.mrb[12].mxu1 %vm359_vm2, %v768_v60 }
 0x467   :  { %1949 = vmatpush3.xpose.msk.msra.mxu1 %vm359_vm2, %v864_v61  ;;  %1950 = vmatprep.mubr.msk.f32.mxu1 %vm2241_vm1, %v2240_v20 }
 0x468   :  { %1958 = vmatprep.subr.mxu1 %v2240_v20 }
 0x46a   :  { %1951 = vmatmul.mubr.msk.f32.vlgmr.msra.gmra.mrb[14].mxu1 %vm359_vm2, %v773_v62 }
 0x46b   :  { %1960 = vmatprep.mubr.msk.f32.mxu1 %vm2241_vm1, %v2240_v20 }
 0x46e   :  { %v1942_v36 = vpop.f32.mrb[6].mxu0 }
 0x46f   :  { %v949_v37 = vpop.f32.mrb[7].mxu0 }
 0x539   :  { %v1030_v12 = vpop.f32.mrb[12].mxu1 }
 0x53a   :  { %v1110_v13 = vmul.f32 0.25, %v1030_v12  ;;  %v1947_v14 = vpop.f32.mrb[13].mxu1 }
 0x53c   :  { %v1112_v16 = vsel %vm2396_vm5, %v1110_v13, -1e+30 }
 0x53d   :  { %v1106_v17 = vpop.f32.mrb[14].mxu1  ;;  %v1114_v18 = vsel %vm516_vm6, %v1112_v16, -inf }
 0x53e   :  { %v1111_v21 = vmul.f32 0.25, %v1106_v17  ;;  %1115 = vmax.xlane.f32.xlu0 %v1114_v18  ;;  %v1952_v22 = vpop.f32.mrb[15].mxu1  ;;  %v48_v17 = vld [vmem:[%s2580_s4 + $0x8] sm:$0xff]  ;;  %v50_v18 = vld [vmem:[%s2580_s4 + $0x18] sm:$0xff] }
 0x53f   :  { %v2063_v22 = vpack.c.bf16 %v50_v18, %v48_v17 }
 0x540   :  { %v1113_v23 = vsel %vm2404_vm7, %v1111_v21, -1e+30  ;;  %v45_v21 = vld [vmem:[%s2579_s3] sm:$0xff] }
 0x541   :  { %v1117_v19 = vsel %vm516_vm6, %v1113_v23, -inf }
 0x542   :  { %1118 = vmax.xlane.f32.xlu1 %v1117_v19  ;;  %v54_v19 = vld [vmem:[%s2580_s4 + $0x38] sm:$0xff] }
 0x553   :  { %880 = vrot.lane.b32.xlu1 %v2420_v15, %s2245_s13 }
 0x557   :  { %2158 = vrot.lane.b32.xlu1 %v2313_v3, %s2247_s15 }
 0x5cb   :  { %v1116_v20 = vpop.xlane.xlu0 %1115 }
 0x5cc   :  { %v1120_v29 = vsub.f32 %v1112_v16, %v1116_v20 }
 0x5ce   :  { %v1122_v30 = vmul.f32 1.442695, %v1120_v29  ;;  %v55_v29 = vld [vmem:[%s2581_s5] sm:$0xff] }
 0x5cf   :  { %v1119_v51 = vpop.xlane.xlu1 %1118 }
 0x5d0   :  { %2172 = vpow2.f32 %v1122_v30  ;;  %v1121_v31 = vsub.f32 %v1113_v23, %v1119_v51  ;;  %v52_v23 = vld [vmem:[%s2580_s4 + $0x28] sm:$0xff]  ;;  %v57_v51 = vld [vmem:[%s2581_s5 + $0x10] sm:$0xff] }
 0x5d1   :  { %v2067_v20 = vpack.c.bf16 %v54_v19, %v52_v23  ;;  %v56_v30 = vld [vmem:[%s2581_s5 + $0x8] sm:$0xff] }
 0x5d2   :  { %v1124_v32 = vmul.f32 1.442695, %v1121_v31  ;;  %v2071_v31 = vpack.c.bf16 %v56_v30, %v55_v29 }
 0x5d3   :  { %v881_v38 = vpop.permute.xlu1 %880 }
 0x5d4   :  { %2174 = vpow2.f32 %v1124_v32  ;;  %v950_v15 = vadd.f32 %v949_v37, %v881_v38  ;;  %v955_v39 = vadd.f32 %v1942_v36, %v881_v38  ;;  %v58_v32 = vld [vmem:[%s2581_s5 + $0x18] sm:$0xff] }
 0x5d6   :  { %1954 = vmatpush3.msra.mxu0 %v950_v15  ;;  %1959 = vmatpush3.msra.mxu1 %v955_v39 }
 0x5d7   :  { %v2159_v42 = vpop.permute.xlu1 %2158  ;;  %2064 = vmatprep.subr.bf16.mxu1 %v2063_v22 }
 0x5d8   :  { %v2161_v44 = vunpack.i.h.bf16 %v2159_v42  ;;  %v2160_v45 = vunpack.i.l.bf16 %v2159_v42  ;;  %v1499_v42 = vsub.s32 5, %v2357_v24 }
 0x5da   :  { %v2173_v33 = vpop.eup %2172  ;;  %v2059_v53 = vpack.c.bf16 %v2161_v44, %v2160_v45 }
 0x5db   :  { %v1126_v34 = vsel %vm516_vm6, %v2173_v33, 0.0 }
 0x5dc   :  { %1127 = vadd.xlane.f32.xlu0 %v1126_v34  ;;  %v59_v34 = vld [vmem:[%s2581_s5 + $0x20] sm:$0xff] }
 0x5de   :  { %v2175_v58 = vpop.eup %2174 }
 0x5df   :  { %v1129_v35 = vsel %vm516_vm6, %v2175_v58, 0.0 }
 0x5e0   :  { %1130 = vadd.xlane.f32.xlu0 %v1129_v35 }
 0x5f6   :  { %2153 = vrot.lane.b32.xlu0 %v2326_v8, %s2247_s15 }
 0x669   :  { %v1128_v40 = vpop.xlane.xlu0 %1127 }
 0x66a   :  { %2176 = vrcp.f32 %v1128_v40 }
 0x66d   :  { %v1131_v41 = vpop.xlane.xlu0 %1130 }
 0x66e   :  { %2178 = vrcp.f32 %v1131_v41  ;;  %v1493_v41 = vsub.s32 4, %v2357_v24 }
 0x671   :  { %v2154_v43 = vpop.permute.xlu0 %2153 }
 0x672   :  { %v2156_v28 = vunpack.i.h.bf16 %v2154_v43  ;;  %v2155_v46 = vunpack.i.l.bf16 %v2154_v43  ;;  %v1494_v43 = vrot.slane %v2360_v26, %v1493_v41 }
 0x674   :  { %v2177_v47 = vpop.eup %2176  ;;  %v2055_v49 = vpack.c.bf16 %v2156_v28, %v2155_v46  ;;  %v1500_v46 = vrot.slane %v2360_v26, %v1499_v42 }
 0x675   :  { %v1134_v52 = vmul.f32 %v2177_v47, %v2173_v33  ;;  %v2075_v33 = vpack.c.bf16 %v58_v32, %v57_v51 }
 0x676   :  { %2056 = vmatprep.subr.bf16.mxu0 %v2055_v49 }
 0x677   :  { %1956 = vmatmul.mubr.msk.f32.vlgmr.msra.gmra.mrb[8].mxu0 %vm516_vm6, %v1134_v52 }
 0x678   :  { %v2179_v8 = vpop.eup %2178  ;;  %2058 = vmatpush3.bf16.msra.mxu0 %v2055_v49 }
 0x679   :  { %v1135_v3 = vmul.f32 %v2179_v8, %v2175_v58  ;;  %2060 = vmatprep.subr.bf16.mxu0 %v2059_v53  ;;  %v60_v58 = vld [vmem:[%s2581_s5 + $0x28] sm:$0xff] }
 0x67a   :  { %v2079_v35 = vpack.c.bf16 %v60_v58, %v59_v34  ;;  %v64_v58 = vld [vmem:[#allocation2 + $0x8] sm:$0x3] }
 0x67b   :  { %1961 = vmatmul.mubr.msk.f32.vlgmr.msra.gmra.mrb[16].mxu1 %vm516_vm6, %v1135_v3 }
 0x67c   :  { %2066 = vmatpush3.bf16.msra.mxu1 %v2063_v22 }
 0x67d   :  { %2068 = vmatprep.subr.bf16.mxu1 %v2067_v20 }
 0x680   :  { %2070 = vmatpush3.bf16.msra.mxu1 %v2067_v20 }
 0x74a   :  { %v1205_v54 = vpop.f32.mrb[8].mxu0 }
 0x74b   :  { %v1957_v9 = vpop.f32.mrb[9].mxu0  ;;  %1967 = vmatprep.mubr.msk.f32.mxu0 %vm359_vm2, %v1205_v54 }
 0x74e   :  { %v1278_v55 = vpop.f32.mrb[16].mxu1 }
 0x74f   :  { %v1962_v56 = vpop.f32.mrb[17].mxu1  ;;  %1968 = vmatmul.mubr.msk.f32.vlgmr.msra.gmra.mrb[10].mxu0 %vm359_vm2, %v1278_v55 }
 0x750   :  { %2062 = vmatpush3.bf16.msra.mxu0 %v2059_v53  ;;  %1974 = vmatprep.mubr.msk.f32.mxu0 %vm359_vm2, %v2445_v48  ;;  %v61_v56 = vld [vmem:[%s2581_s5 + $0x30] sm:$0xff]  ;;  %s2248_s5 = smov [#allocation5]  }
 0x751   :  { %2072 = vmatprep.subr.bf16.mxu0 %v2071_v31  ;;  %s1737_s17 = sshll.u32 %s2248_s5, 4  ;;  %s1738_s17 = int_to_ptr.vmem [resolvable:$true] %s1737_s17 }
 0x752   :  { %s2210_s18 = scalar_lea.vmem %s1738_s17, 256  ;;  %p2215_p9 = scmp.lt.s32.totalorder %s1738_s17, %s1738_s17 }
 0x753   :  { %p2211_p8 = scmp.ne.s32.totalorder %s1738_s17, %s2210_s18  ;;  %p2216_p10 = scmp.lt.s32.totalorder %s2210_s18, %s2210_s18 }
 0x755   :  { %p2217_p11 = por %p2216_p10, %p2215_p9 }
 0x757   :  { %1975 = vmatmul.mubr.msk.f32.vlgmr.msra.gmra.mrb[10].mxu0 %vm359_vm2, %v2447_v50  ;;  %p2218_p12 = pnand %p2217_p11, %p2211_p8 }
 0x758   :  { %2074 = vmatpush3.bf16.msra.mxu0 %v2071_v31 }
 0x759   :  { %2076 = vmatprep.subr.bf16.mxu0 %v2075_v33 }
 0x75c   :  { %2078 = vmatpush3.bf16.msra.mxu0 %v2075_v33 }
 0x75d   :  { %2080 = vmatprep.subr.bf16.mxu0 %v2079_v35 }
 0x760   :  { %2082 = vmatpush3.bf16.msra.mxu0 %v2079_v35  ;;  %v1719_v35 = vrot.slane %v64_v58, %v2363_v27 }
 0x82a   :  { %v1976_v60 = vpop.f32.mrb[10].mxu0 }
 0x82b   :  { %v1461_v61 = vadd.f32 %v1976_v60, %v1459_v59  ;;  %v1447_v62 = vpop.f32.mrb[11].mxu0  ;;  %v1517_v60 = vsub.s32 6, %v2357_v24 }
 0x82c   :  { %v1460_v63 = vadd.f32 %v1459_v59, %v1447_v62  ;;  %v2083_v59 = vpack.c.bf16 %v62_v57, %v61_v56 }
 0x82d   :  { %v1463_v0 = vadd.f32 %v1461_v61, %v2339_v10  ;;  %v1518_v61 = vrot.slane %v2360_v26, %v1517_v60 }
 0x82e   :  { %v1462_v1 = vadd.f32 %v1460_v63, %v2321_v6  ;;  %v46_v6 = vld [vmem:[%s2579_s3 + $0x8] sm:$0xff]  ;;  %2084 = vmatprep.subr.bf16.mxu0 %v2083_v59 }
 0x82f   :  { %v1467_v2 = vsel %vm85_vm0, %v1463_v0, 0.0  ;;  %2086 = vmatpush3.bf16.msra.mxu0 %v2083_v59 }
 0x830   :  { %1468 = vadd.xlane.f32.xlu0 %v1467_v2  ;;  %v1464_v48 = vsel %vm85_vm0, %v1462_v1, 0.0 }
 0x831   :  { %1465 = vadd.xlane.f32.xlu1 %v1464_v48 }
 0x8bd   :  { %v1469_v4 = vpop.xlane.xlu0 %1468 }
 0x8be   :  { %v1472_v50 = vmul.f32 0.03125, %v1469_v4  ;;  %v1466_v5 = vpop.xlane.xlu1 %1465  ;;  %v1604_v4 = vsub.s32 7, %v2357_v24 }
 0x8bf   :  { %v1471_v7 = vmul.f32 0.03125, %v1466_v5 }
 0x8c0   :  { %v1474_v11 = vsub.f32 %v1463_v0, %v1472_v50  ;;  %v1605_v50 = vrot.slane %v2360_v26, %v1604_v4 }
 0x8c1   :  { %v1473_v12 = vsub.f32 %v1462_v1, %v1471_v7 }
 0x8c2   :  { %v1476_v13 = vmul.f32 %v1474_v11, %v1474_v11 }
 0x8c3   :  { %v1475_v14 = vmul.f32 %v1473_v12, %v1473_v12 }
 0x8c4   :  { %v1480_v16 = vsel %vm85_vm0, %v1476_v13, 0.0 }
 0x8c5   :  { %1481 = vadd.xlane.f32.xlu1 %v1480_v16  ;;  %v1477_v10 = vsel %vm85_vm0, %v1475_v14, 0.0 }
 0x8c6   :  { %1478 = vadd.xlane.f32.xlu0 %v1477_v10 }
 0x8d6   :  { %1510 = vperm.xlu1 %2163, %v46_v6  }
 0x8dc   :  { %1505 = vperm.xlu0 %2162, %v45_v21  }
 0x952   :  { %v1482_v36 = vpop.xlane.xlu1 %1481 }
 0x953   :  { %v1484_v37 = vmul.f32 0.03125, %v1482_v36  ;;  %v1479_v38 = vpop.xlane.xlu0 %1478 }
 0x954   :  { %v1483_v15 = vmul.f32 0.03125, %v1479_v38 }
 0x955   :  { %v1486_v39 = vadd.f32 1e-05, %v1484_v37  ;;  %v1725_v37 = vrot.slane %v64_v58, %v169_v25 }
 0x956   :  { %v1485_v40 = vadd.f32 1e-05, %v1483_v15  ;;  %v2534_v3 = vpop.permute.xlu1 %1510 }
 0x957   :  { %2180 = vrsqrt.f32 %v1486_v39 }
 0x958   :  { %2182 = vrsqrt.f32 %v1485_v40 }
 0x95b   :  { %v2532_v8 = vpop.permute.xlu0 %1505 }
 0x961   :  { %v2181_v44 = vpop.eup %2180 }
 0x962   :  { %v2183_v45 = vpop.eup %2182  ;;  %v1490_v28 = vmul.f32 %v2181_v44, %v1474_v11 }
 0x963   :  { %v1489_v47 = vmul.f32 %v2183_v45, %v1473_v12 }
 0x964   :  { %v1496_v49 = vmul.f32 %v1494_v43, %v1490_v28 }
 0x965   :  { %v1495_v52 = vmul.f32 %v1494_v43, %v1489_v47 }
 0x966   :  { %v1502_v53 = vadd.f32 %v1500_v46, %v1496_v49 }
 0x967   :  { %v1501_v54 = vadd.f32 %v1500_v46, %v1495_v52 }
 0x968   :  { %v1514_v55 = vmul.f32 %v2534_v3, %v1502_v53 }
 0x969   :  { %v1513_v9 = vmul.f32 %v2532_v8, %v1501_v54 }
 0x96b   :  { %1985 = vmatprep.mubr.msk.f32.mxu1 %vm85_vm0, %v1513_v9 }
 0x96c   :  { %1986 = vmatmul.mubr.msk.f32.vlgmr.msra.gmra.mrb[18].mxu1 %vm85_vm0, %v1514_v55 }
 0xa3f   :  { %v1987_v62 = vpop.f32.mrb[18].mxu1 }
 0xa40   :  { %v1597_v63 = vadd.f32 %v1987_v62, %v1518_v61  ;;  %v1591_v0 = vpop.f32.mrb[19].mxu1 }
 0xa41   :  { %v1592_v1 = vadd.f32 %v1591_v0, %v1518_v61 }
 0xa42   :  { %v1601_v48 = vmax.f32 %v1597_v63, 0.0 }
 0xa43   :  { %v1600_v2 = vmax.f32 %v1592_v1, 0.0 }
 0xa45   :  { %2004 = vmatprep.mubr.msk.f32.mxu0 %vm1606_vm8, %v1600_v2 }
 0xa46   :  { %2005 = vmatmul.mubr.msk.f32.vlgmr.msra.gmra.mrb[12].mxu0 %vm1606_vm8, %v1601_v48 }
 0xb19   :  { %v2006_v5 = vpop.f32.mrb[12].mxu0 }
 0xb1a   :  { %v1685_v7 = vadd.f32 %v2006_v5, %v1605_v50  ;;  %v1679_v11 = vpop.f32.mrb[13].mxu0 }
 0xb1b   :  { %v1680_v12 = vadd.f32 %v1679_v11, %v1605_v50 }
 0xb1c   :  { %v1689_v13 = vadd.f32 %v1685_v7, %v1514_v55 }
 0xb1d   :  { %v1688_v14 = vadd.f32 %v1680_v12, %v1513_v9 }
 0xb1e   :  { %v1693_v16 = vsel %vm85_vm0, %v1689_v13, 0.0 }
 0xb1f   :  { %1694 = vadd.xlane.f32.xlu0 %v1693_v16  ;;  %v1690_v10 = vsel %vm85_vm0, %v1688_v14, 0.0 }
 0xb20   :  { %1691 = vadd.xlane.f32.xlu1 %v1690_v10 }
 0xbac   :  { %v1695_v6 = vpop.xlane.xlu0 %1694 }
 0xbad   :  { %v1697_v17 = vmul.f32 0.03125, %v1695_v6  ;;  %v1692_v18 = vpop.xlane.xlu1 %1691 }
 0xbae   :  { %v1696_v21 = vmul.f32 0.03125, %v1692_v18 }
 0xbaf   :  { %v1699_v22 = vsub.f32 %v1689_v13, %v1697_v17 }
 0xbb0   :  { %v1698_v23 = vsub.f32 %v1688_v14, %v1696_v21 }
 0xbb1   :  { %v1701_v20 = vmul.f32 %v1699_v22, %v1699_v22 }
 0xbb2   :  { %v1700_v19 = vmul.f32 %v1698_v23, %v1698_v23 }
 0xbb3   :  { %v1705_v29 = vsel %vm85_vm0, %v1701_v20, 0.0 }
 0xbb4   :  { %v1702_v26 = vsel %vm85_vm0, %v1700_v19, 0.0 }
 0xbb5   :  { %1703 = vadd.xlane.f32.xlu1 %v1702_v26 }
 0xbb9   :  { %1706 = vadd.xlane.f32.xlu1 %v1705_v29 }
 0xc42   :  { %v1704_v30 = vpop.xlane.xlu1 %1703 }
 0xc43   :  { %v1708_v51 = vmul.f32 0.03125, %v1704_v30 }
 0xc45   :  { %v1710_v31 = vadd.f32 1e-05, %v1708_v51 }
 0xc46   :  { %v1707_v32 = vpop.xlane.xlu1 %1706 }
 0xc47   :  { %2184 = vrsqrt.f32 %v1710_v31  ;;  %v1709_v33 = vmul.f32 0.03125, %v1707_v32 }
 0xc49   :  { %v1711_v34 = vadd.f32 1e-05, %v1709_v33 }
 0xc4b   :  { %2186 = vrsqrt.f32 %v1711_v34 }
 0xc51   :  { %v2185_v36 = vpop.eup %2184 }
 0xc52   :  { %v1714_v38 = vmul.f32 %v2185_v36, %v1698_v23 }
 0xc54   :  { %v1720_v15 = vmul.f32 %v1719_v35, %v1714_v38 }
 0xc55   :  { %v2187_v39 = vpop.eup %2186 }
 0xc56   :  { %v1715_v40 = vmul.f32 %v2187_v39, %v1699_v22  ;;  %v1726_v41 = vadd.f32 %v1725_v37, %v1720_v15 }
 0xc58   :  { %v1721_v42 = vmul.f32 %v1719_v35, %v1715_v40  ;;  %v1728_v43 = vmul.f32 %v1726_v41, %v2532_v8 }
 0xc5a   :  { %v1727_v44 = vadd.f32 %v1725_v37, %v1721_v42  ;;  %1730 = vst.msk [vmem:[#allocation5] sm:$0xff] %vm85_vm0, %v1728_v43 }
 0xc5c   :  { %v1729_v45 = vmul.f32 %v1727_v44, %v2534_v3 }
 0xc5e   :  { %1731 = vst.msk [vmem:[#allocation5 + $0x8] sm:$0xff] %vm85_vm0, %v1729_v45 }
 0xc5f   :  { %2221 = shalt.err (!%p2218_p12)
}
 0xc60   :  { %s2222_s21 = scalar_lea.hbm %s2583_s7, 256 }
 0xc61   :  { %p2223_p13 = scmp.ne.s32.totalorder %s2583_s7, %s2222_s21  ;;  %p2226_p0 = scmp.lt.u32.totalorder %s2222_s21, %s2583_s7 }
 0xc63   :  { %p2228_p1 = pnand %p2226_p0, %p2223_p13 }
 0xc65   :  { %2231 = shalt.err (!%p2228_p1)
}
 0xc66   :  { %1743 = dma.vmem_to_hbm [thread:$0]  %s1738_s17, 256, %s2583_s7, [#allocation4], %s2237_s11, %s2237_s11, %s2238_s12  }
 0xc67   :  { %2234 = dma.done.wait [#allocation4], 256  }
 0xc68   :  { %2235 = vsyncadd [#allocation4], 4294967040 }
 0xc69   :  { %1747 = vsyncpa [#allocation3], 1 }
 0xc6a   :  { %1748 = vsyncpa [#allocation4], 1 }

</bundles_post_ra>
